<compile_context>
chip_gen: v6e
topology: v6e:2x2x1
jax: 0.10.0
libtpu: 0.0.40
codegen_flags: <defaults>
</compile_context>

<pallas_src>
import functools

import jax
import jax.numpy as jnp
from jax.experimental import pallas as pl
from jax.experimental.pallas import tpu as pltpu

_LANE = 128     # pad output dim to a multiple of this for unmasked stores
_SUBLANE = 8    # pad fused weight+bias rows to a multiple of this


def _linear_kernel(x_ref, wb_ref, o_ref, *, input_dim):
    # In-kernel cast (handles int inputs, no-op for f32), single MXU matmul
    # with f32 accumulate against the weight rows of the fused buffer, then a
    # VPU broadcast-add of the bias row.  Lane-dense (batch, 128) store.
    x = x_ref[...].astype(jnp.float32)
    wb = wb_ref[...]
    acc = jnp.dot(x, wb[:input_dim, :], preferred_element_type=jnp.float32)
    o_ref[...] = acc + wb[input_dim:input_dim + 1, :]


def prepare_params(weight, bias):
    """One-time parameter prep (hoisted out of the per-call path).

    weight: (output_dim, input_dim), bias: (output_dim,)
      -> wb: (rows_pad, n_pad) f32 where
           wb[:input_dim, :output_dim] = W.T
           wb[input_dim,  :output_dim] = bias
         and all padded entries are zero (so they never affect real outputs).
    Fusing bias into the weight buffer drops one pallas_call input (one DMA).
    """
    output_dim, input_dim = weight.shape
    n_pad = max(_LANE, ((output_dim + _LANE - 1) // _LANE) * _LANE)
    rows_pad = ((input_dim + 1 + _SUBLANE - 1) // _SUBLANE) * _SUBLANE

    wb = jnp.zeros((rows_pad, n_pad), jnp.float32)
    wb = wb.at[:input_dim, :output_dim].set(weight.T.astype(jnp.float32))
    wb = wb.at[input_dim, :output_dim].set(bias.astype(jnp.float32))
    return wb


@functools.partial(jax.jit, static_argnums=(2,))
def dummy_net_forward(x, wb, output_dim):
    """Pallas equivalent of DummyNet.forward.

    x         : (batch, input_dim) float32 or int32 (cast in-kernel, matching
                `x.float() if x.dtype == torch.int64 else x`)
    wb        : fused weight+bias buffer from prepare_params
    output_dim: true output dim; padded columns are sliced off (fused by jit).
    returns   : (batch, output_dim) float32
    """
    batch, input_dim = x.shape
    n_pad = wb.shape[1]

    out = pl.pallas_call(
        functools.partial(_linear_kernel, input_dim=input_dim),
        out_shape=jax.ShapeDtypeStruct((batch, n_pad), jnp.float32),
        in_specs=[
            pl.BlockSpec(memory_space=pltpu.MemorySpace.VMEM),
            pl.BlockSpec(memory_space=pltpu.MemorySpace.VMEM),
        ],
        out_specs=pl.BlockSpec(memory_space=pltpu.MemorySpace.VMEM),
    )(x, wb)

    return out[:, :output_dim]


if __name__ == "__main__":
    # Module default shapes: input_dim=5, output_dim=10.  Small batch of 8.
    input_dim, output_dim, batch = 5, 10, 8

    key = jax.random.PRNGKey(0)
    kx, kw, kb = jax.random.split(key, 3)

    # DummyNet.__init__ uses torch.zeros for the parameters; initialize with
    # PRNGKey(0) randoms instead so the output is non-trivial for checking.
    weight = jax.random.normal(kw, (output_dim, input_dim), dtype=jnp.float32)
    bias = jax.random.normal(kb, (output_dim,), dtype=jnp.float32)
    x = jax.random.normal(kx, (batch, input_dim), dtype=jnp.float32)

    # One-time parameter prep (transpose + bias fuse + lane/sublane padding).
    wb = prepare_params(weight, bias)

    # Float path.
    y = dummy_net_forward(x, wb, output_dim)
    jax.block_until_ready(y)
    y_ref = x @ weight.T + bias
    assert y.shape == (batch, output_dim)
    assert jnp.allclose(y, y_ref, atol=1e-5, rtol=1e-5)

    # Integer-input path (x.float() in torch); cast happens inside the kernel.
    xi = jnp.round(x * 10.0).astype(jnp.int32)
    yi = dummy_net_forward(xi, wb, output_dim)
    jax.block_until_ready(yi)
    yi_ref = xi.astype(jnp.float32) @ weight.T + bias
    assert jnp.allclose(yi, yi_ref, atol=1e-5, rtol=1e-5)

    print("KERNEL_OK")
</pallas_src>

<mosaic_0001>
module attributes {stable_mosaic.version = 11 : i64} {
  func.func @_linear_kernel(%arg0: memref<8x5xf32, #tpu.memory_space<vmem>>, %arg1: memref<8x128xf32, #tpu.memory_space<vmem>>, %arg2: memref<8x128xf32, #tpu.memory_space<vmem>>) attributes {dimension_semantics = [], scalar_prefetch = 0 : i64, scratch_operands = 0 : i64, tpu.core_type = #tpu.core_type<tc>} {
    %c0 = arith.constant 0 : index
    %c0_0 = arith.constant 0 : index
    %0 = vector.load %arg0[%c0, %c0_0] : memref<8x5xf32, #tpu.memory_space<vmem>>, vector<8x5xf32>
    %c0_1 = arith.constant 0 : index
    %c0_2 = arith.constant 0 : index
    %1 = vector.load %arg1[%c0_1, %c0_2] : memref<8x128xf32, #tpu.memory_space<vmem>>, vector<8x128xf32>
    %2 = vector.extract_strided_slice %1 {offsets = [0, 0], sizes = [5, 128], strides = [1, 1]} : vector<8x128xf32> to vector<5x128xf32>
    %cst = arith.constant dense<0.000000e+00> : vector<8x128xf32>
    %3 = tpu.matmul %0, %2, %cst {dimension_numbers = #tpu.dot_dimension_numbers<[1], [0], [0], [1], [0, 0, 1, 1], [], []>} : vector<8x5xf32>, vector<5x128xf32>, vector<8x128xf32> -> vector<8x128xf32>
    %4 = vector.extract_strided_slice %1 {offsets = [5, 0], sizes = [1, 128], strides = [1, 1]} : vector<8x128xf32> to vector<1x128xf32>
    %5 = vector.broadcast %4 : vector<1x128xf32> to vector<8x128xf32>
    %6 = arith.addf %3, %5 : vector<8x128xf32>
    %c0_3 = arith.constant 0 : index
    %c0_4 = arith.constant 0 : index
    %7 = vector.load %arg2[%c0_3, %c0_4] : memref<8x128xf32, #tpu.memory_space<vmem>>, vector<8x128xf32>
    tpu.vector_store %arg2[%c0_3, %c0_4], %6 {strides = array<i32>} : memref<8x128xf32, #tpu.memory_space<vmem>>, vector<8x128xf32>,
    return
  }
}

</mosaic_0001>

<bundles_post_ra>
// kernel: dummy_net_forward.1
= control target key start
LH: loop header
LB: loop body
LE: loop exit
PB: predicated region body
PF: predicated region fallthrough
CT: control target
= control target key end

     0   :  { %7 = vsyncpa [#allocation3], 0  ;;  %s246_s0 = inlined_call_operand.hbm [shape: f32[8,5], index: 0, kind: input, shape index: {}]   ;;  %s247_s1 = inlined_call_operand.hbm [shape: f32[8,128], index: 1, kind: input, shape index: {}]   ;;  %s248_s2 = inlined_call_operand.hbm [shape: f32[8,128], index: 2, kind: output, shape index: {}]  }
   0x1   :  { %8 = vsyncpa [#allocation6], 0 }
   0x2   :  { %9 = vsyncpa [#allocation4], 0  ;;  %s217_s9 = smov [#allocation2]   ;;  %s218_s11 = smov [#allocation5]  }
   0x3   :  { %s16_s10 = sshll.u32 %s217_s9, 4  ;;  %s26_s12 = sshll.u32 %s218_s11, 4  ;;  %s17_s10 = int_to_ptr.vmem [resolvable:$true] %s16_s10  ;;  %s27_s12 = int_to_ptr.vmem [resolvable:$true] %s26_s12 }
   0x4   :  { %s159_s13 = scalar_lea.vmem %s17_s10, 128  ;;  %p164_p1 = scmp.lt.s32.totalorder %s17_s10, %s17_s10 }
   0x5   :  { %p160_p0 = scmp.ne.s32.totalorder %s17_s10, %s159_s13  ;;  %p165_p2 = scmp.lt.s32.totalorder %s159_s13, %s159_s13 }
   0x7   :  { %p166_p3 = por %p165_p2, %p164_p1 }
   0x9   :  { %p167_p4 = pnand %p166_p3, %p160_p0 }
   0xb   :  { %170 = shalt.err (!%p167_p4)
}
   0xc   :  { %19 = dma.hbm_to_vmem [thread:$0]  %s246_s0, 128, %s17_s10, [#allocation3]  }
   0xd   :  { %s179_s16 = scalar_lea.vmem %s27_s12, 128  ;;  %p184_p6 = scmp.lt.s32.totalorder %s27_s12, %s27_s12 }
   0xe   :  { %p180_p5 = scmp.ne.s32.totalorder %s27_s12, %s179_s16  ;;  %p185_p7 = scmp.lt.s32.totalorder %s179_s16, %s179_s16 }
  0x10   :  { %p186_p8 = por %p185_p7, %p184_p6 }
  0x12   :  { %p187_p9 = pnand %p186_p8, %p180_p5 }
  0x14   :  { %190 = shalt.err (!%p187_p9)
}
  0x15   :  { %29 = dma.hbm_to_vmem [thread:$0]  %s247_s1, 128, %s27_s12, [#allocation6]  }
  0x16   :  { %211 = dma.done.wait [#allocation3], 128  }
  0x17   :  { %212 = vsyncadd [#allocation3], 4294967168 }
  0x18   :  { %213 = dma.done.wait [#allocation6], 128  }
  0x19   :  { %214 = vsyncadd [#allocation6], 4294967168  ;;  %v219_v0 = vmov 0.0   ;;  %vm220_vm0 = vmmov 0   ;;  %vm46_vm1 = vcmask 1044480   ;;  %vm42_vm2 = vcmask 39936  }
  0x1a   :  { %141 = vmatprep.subr.mxu0 %v219_v0  ;;  %143 = vmatprep.mubr.msk.f32.mxu0 %vm220_vm0, %v219_v0  ;;  %v37_v1 = vld [vmem:[#allocation5] sm:$0xff]  ;;  %v36_v2 = vld [vmem:[#allocation2] sm:$0xff]  ;;  %v38_v3 = vlaneseq  ;;  %s221_s0 = smov [#allocation7]  }
  0x1b   :  { %142 = vmatpush3.msk.msra.mxu0 %vm46_vm1, %v37_v1  ;;  %s127_s1 = sshll.u32 %s221_s0, 4  ;;  %s128_s1 = int_to_ptr.vmem [resolvable:$true] %s127_s1 }
  0x1c   :  { %144 = vmatmul.mubr.msk.f32.vlgmr.msra.gmra.mxu0 %vm42_vm2, %v36_v2  ;;  %v39_v4 = vshrl.u32 %v38_v3, 7  ;;  %s191_s19 = scalar_lea.vmem %s128_s1, 128  ;;  %p196_p11 = scmp.lt.s32.totalorder %s128_s1, %s128_s1 }
  0x1d   :  { %p192_p10 = scmp.ne.s32.totalorder %s128_s1, %s191_s19  ;;  %p197_p12 = scmp.lt.s32.totalorder %s191_s19, %s191_s19 }
  0x1e   :  { %v40_v5 = vsub.s32 5, %v39_v4 }
  0x1f   :  { %p198_p13 = por %p197_p12, %p196_p11 }
  0x20   :  { %v41_v6 = vrot.slane %v37_v1, %v40_v5 }
  0x21   :  { %p199_p0 = pnand %p198_p13, %p192_p10 }
  0xdc   :  { %v116_v7 = vpop.f32.mrf.mxu0 }
  0xdd   :  { %v117_v8 = vadd.f32 %v116_v7, %v41_v6 }
  0xde   :  { %v145_v9 = vpop.f32.mrf.mxu0 }
  0xdf   :  { %120 = vst [vmem:[#allocation7] sm:$0xff] %v117_v8 }
  0xe0   :  { %202 = shalt.err (!%p199_p0)
}
  0xe1   :  { %130 = dma.vmem_to_hbm [thread:$0]  %s128_s1, 128, %s248_s2, [#allocation4]  }
  0xe2   :  { %215 = dma.done.wait [#allocation4], 128  }
  0xe3   :  { %216 = vsyncadd [#allocation4], 4294967168 }
  0xe4   :  { %134 = vsyncpa [#allocation3], 1 }
  0xe5   :  { %135 = vsyncpa [#allocation6], 1 }
  0xe6   :  { %136 = vsyncpa [#allocation4], 1 }

</bundles_post_ra>
